<compile_context>
chip_gen: v6e
topology: v6e:2x2x1
jax: 0.10.0
libtpu: 0.0.40
codegen_flags: <defaults>
</compile_context>

<pallas_src>
import jax
import jax.numpy as jnp
from jax.experimental import pallas as pl
from jax.experimental.pallas import tpu as pltpu


def _make_kernel(negative_slope: float, cin: int, cout: int):
    def kernel(w_ref, b_ref, x_ref, o_ref):
        # w_ref: SMEM (cout, cin) f32, b_ref: SMEM (cout,) f32
        # x_ref: VMEM (1, cin, T), o_ref: VMEM (1, cout, T)
        xs = [x_ref[0, ci:ci + 1, :] for ci in range(cin)]  # each (1, T), lane-dense
        rows = []
        for co in range(cout):
            acc = xs[0] * w_ref[co, 0]
            for ci in range(1, cin):
                acc = acc + xs[ci] * w_ref[co, ci]
            rows.append(acc + b_ref[co])
        y = jnp.concatenate(rows, axis=0)  # (cout, T) — single dense store
        if negative_slope != 1.0:          # trace-time specialization
            y = jnp.where(y > 0, y, negative_slope * y)
        o_ref[0] = y.astype(o_ref.dtype)
    return kernel


def conv1x1_leaky(x_nchw, weight, bias, negative_slope=1.0, *, spatial_tile=2048):
    """x_nchw: (N, Cin, H, W); weight: (Cout, Cin) [or (Cout, Cin, 1, 1)]; bias: (Cout,)."""
    N, Cin, H, W = x_nchw.shape
    if weight.ndim == 4:  # accept PyTorch-style (Cout, Cin, 1, 1)
        weight = weight.reshape(weight.shape[0], weight.shape[1])
    Cout, Cin_w = weight.shape
    assert Cin_w == Cin

    HW = H * W
    x3 = x_nchw.reshape(N, Cin, HW)  # contiguous reshape, no transpose

    # Lane-tile selection: multiple of 128 (or the full extent if HW is not).
    if HW % 128 == 0:
        T = max(128, (min(spatial_tile, HW) // 128) * 128)
    else:
        T = HW
    num_t = pl.cdiv(HW, T)

    w = weight.astype(jnp.float32)   # (Cout, Cin) -> SMEM scalars
    b = bias.astype(jnp.float32)     # (Cout,)     -> SMEM scalars

    kernel = _make_kernel(float(negative_slope), Cin, Cout)

    out3 = pl.pallas_call(
        kernel,
        out_shape=jax.ShapeDtypeStruct((N, Cout, HW), jnp.float32),
        grid=(N, num_t),
        in_specs=[
            pl.BlockSpec(memory_space=pltpu.MemorySpace.SMEM),    # weight
            pl.BlockSpec(memory_space=pltpu.MemorySpace.SMEM),    # bias
            pl.BlockSpec((1, Cin, T), lambda n, t: (n, 0, t)),    # x
        ],
        out_specs=pl.BlockSpec((1, Cout, T), lambda n, t: (n, 0, t)),
        compiler_params=pltpu.CompilerParams(
            dimension_semantics=("parallel", "parallel"),
        ),
    )(w, b, x3)

    return out3.reshape(N, Cout, H, W)


if __name__ == "__main__":
    key = jax.random.PRNGKey(0)
    kx, kw, kb = jax.random.split(key, 3)

    # Shapes consistent with Conv2d(3, 8, 1): NCHW with 3 input channels.
    N, Cin, H, W = 2, 3, 16, 16
    Cout = 8
    NEG_SLOPE = 1.0  # mirrors `negative_slope = 1` in the PyTorch module

    x = jax.random.normal(kx, (N, Cin, H, W), dtype=jnp.float32)

    # Deterministic params (mimics Conv2d uniform init bound 1/sqrt(fan_in)).
    bound = 1.0 / jnp.sqrt(jnp.float32(Cin * 1 * 1))
    weight = jax.random.uniform(kw, (Cout, Cin), minval=-bound, maxval=bound,
                                dtype=jnp.float32)
    bias = jax.random.uniform(kb, (Cout,), minval=-bound, maxval=bound,
                              dtype=jnp.float32)

    out = conv1x1_leaky(x, weight, bias, negative_slope=NEG_SLOPE)
    jax.block_until_ready(out)

    # Plain-JAX reference (full-precision contraction).
    ref = jnp.einsum("nchw,oc->nohw", x, weight,
                     precision=jax.lax.Precision.HIGHEST)
    ref = ref + bias[None, :, None, None]
    ref = jnp.where(ref > 0, ref, NEG_SLOPE * ref)

    assert out.shape == (N, Cout, H, W)
    assert jnp.allclose(out, ref, atol=1e-5, rtol=1e-5)

    print("KERNEL_OK")
</pallas_src>

<mosaic_0001>
module attributes {stable_mosaic.version = 11 : i64} {
  func.func @kernel(%arg0: i32, %arg1: i32, %arg2: memref<8x3xf32, #tpu.memory_space<smem>>, %arg3: memref<8xf32, #tpu.memory_space<smem>>, %arg4: memref<1x3x256xf32, #tpu.memory_space<vmem>>, %arg5: memref<1x8x256xf32, #tpu.memory_space<vmem>>) attributes {dimension_semantics = [#tpu.dimension_semantics<parallel>, #tpu.dimension_semantics<parallel>], iteration_bounds = array<i64: 2, 1>, scalar_prefetch = 0 : i64, scratch_operands = 0 : i64, tpu.core_type = #tpu.core_type<tc>, window_params = [{transform_indices = @transform_0, window_bounds = array<i64: 8, 3>}, {transform_indices = @transform_1, window_bounds = array<i64: 8>}, {transform_indices = @transform_2, window_bounds = array<i64: 1, 3, 256>}, {transform_indices = @transform_3, window_bounds = array<i64: 1, 8, 256>}]} {
    %c0 = arith.constant 0 : index
    %c0_0 = arith.constant 0 : index
    %c0_1 = arith.constant 0 : index
    %0 = vector.load %arg4[%c0, %c0_0, %c0_1] : memref<1x3x256xf32, #tpu.memory_space<vmem>>, vector<1x1x256xf32>
    %1 = vector.shape_cast %0 : vector<1x1x256xf32> to vector<1x256xf32>
    %c0_2 = arith.constant 0 : index
    %c1 = arith.constant 1 : index
    %c0_3 = arith.constant 0 : index
    %2 = vector.load %arg4[%c0_2, %c1, %c0_3] : memref<1x3x256xf32, #tpu.memory_space<vmem>>, vector<1x1x256xf32>
    %3 = vector.shape_cast %2 : vector<1x1x256xf32> to vector<1x256xf32>
    %c0_4 = arith.constant 0 : index
    %c2 = arith.constant 2 : index
    %c0_5 = arith.constant 0 : index
    %4 = vector.load %arg4[%c0_4, %c2, %c0_5] : memref<1x3x256xf32, #tpu.memory_space<vmem>>, vector<1x1x256xf32>
    %5 = vector.shape_cast %4 : vector<1x1x256xf32> to vector<1x256xf32>
    %c0_6 = arith.constant 0 : index
    %c0_7 = arith.constant 0 : index
    %6 = memref.load %arg2[%c0_6, %c0_7] : memref<8x3xf32, #tpu.memory_space<smem>>
    %7 = vector.broadcast %6 : f32 to vector<1x256xf32>
    %8 = arith.mulf %1, %7 : vector<1x256xf32>
    %c0_8 = arith.constant 0 : index
    %c1_9 = arith.constant 1 : index
    %9 = memref.load %arg2[%c0_8, %c1_9] : memref<8x3xf32, #tpu.memory_space<smem>>
    %10 = vector.broadcast %9 : f32 to vector<1x256xf32>
    %11 = arith.mulf %3, %10 : vector<1x256xf32>
    %12 = arith.addf %8, %11 : vector<1x256xf32>
    %c0_10 = arith.constant 0 : index
    %c2_11 = arith.constant 2 : index
    %13 = memref.load %arg2[%c0_10, %c2_11] : memref<8x3xf32, #tpu.memory_space<smem>>
    %14 = vector.broadcast %13 : f32 to vector<1x256xf32>
    %15 = arith.mulf %5, %14 : vector<1x256xf32>
    %16 = arith.addf %12, %15 : vector<1x256xf32>
    %c0_12 = arith.constant 0 : index
    %17 = memref.load %arg3[%c0_12] : memref<8xf32, #tpu.memory_space<smem>>
    %18 = vector.broadcast %17 : f32 to vector<1x256xf32>
    %19 = arith.addf %16, %18 : vector<1x256xf32>
    %c1_13 = arith.constant 1 : index
    %c0_14 = arith.constant 0 : index
    %20 = memref.load %arg2[%c1_13, %c0_14] : memref<8x3xf32, #tpu.memory_space<smem>>
    %21 = vector.broadcast %20 : f32 to vector<1x256xf32>
    %22 = arith.mulf %1, %21 : vector<1x256xf32>
    %c1_15 = arith.constant 1 : index
    %c1_16 = arith.constant 1 : index
    %23 = memref.load %arg2[%c1_15, %c1_16] : memref<8x3xf32, #tpu.memory_space<smem>>
    %24 = vector.broadcast %23 : f32 to vector<1x256xf32>
    %25 = arith.mulf %3, %24 : vector<1x256xf32>
    %26 = arith.addf %22, %25 : vector<1x256xf32>
    %c1_17 = arith.constant 1 : index
    %c2_18 = arith.constant 2 : index
    %27 = memref.load %arg2[%c1_17, %c2_18] : memref<8x3xf32, #tpu.memory_space<smem>>
    %28 = vector.broadcast %27 : f32 to vector<1x256xf32>
    %29 = arith.mulf %5, %28 : vector<1x256xf32>
    %30 = arith.addf %26, %29 : vector<1x256xf32>
    %c1_19 = arith.constant 1 : index
    %31 = memref.load %arg3[%c1_19] : memref<8xf32, #tpu.memory_space<smem>>
    %32 = vector.broadcast %31 : f32 to vector<1x256xf32>
    %33 = arith.addf %30, %32 : vector<1x256xf32>
    %c2_20 = arith.constant 2 : index
    %c0_21 = arith.constant 0 : index
    %34 = memref.load %arg2[%c2_20, %c0_21] : memref<8x3xf32, #tpu.memory_space<smem>>
    %35 = vector.broadcast %34 : f32 to vector<1x256xf32>
    %36 = arith.mulf %1, %35 : vector<1x256xf32>
    %c2_22 = arith.constant 2 : index
    %c1_23 = arith.constant 1 : index
    %37 = memref.load %arg2[%c2_22, %c1_23] : memref<8x3xf32, #tpu.memory_space<smem>>
    %38 = vector.broadcast %37 : f32 to vector<1x256xf32>
    %39 = arith.mulf %3, %38 : vector<1x256xf32>
    %40 = arith.addf %36, %39 : vector<1x256xf32>
    %c2_24 = arith.constant 2 : index
    %c2_25 = arith.constant 2 : index
    %41 = memref.load %arg2[%c2_24, %c2_25] : memref<8x3xf32, #tpu.memory_space<smem>>
    %42 = vector.broadcast %41 : f32 to vector<1x256xf32>
    %43 = arith.mulf %5, %42 : vector<1x256xf32>
    %44 = arith.addf %40, %43 : vector<1x256xf32>
    %c2_26 = arith.constant 2 : index
    %45 = memref.load %arg3[%c2_26] : memref<8xf32, #tpu.memory_space<smem>>
    %46 = vector.broadcast %45 : f32 to vector<1x256xf32>
    %47 = arith.addf %44, %46 : vector<1x256xf32>
    %c3 = arith.constant 3 : index
    %c0_27 = arith.constant 0 : index
    %48 = memref.load %arg2[%c3, %c0_27] : memref<8x3xf32, #tpu.memory_space<smem>>
    %49 = vector.broadcast %48 : f32 to vector<1x256xf32>
    %50 = arith.mulf %1, %49 : vector<1x256xf32>
    %c3_28 = arith.constant 3 : index
    %c1_29 = arith.constant 1 : index
    %51 = memref.load %arg2[%c3_28, %c1_29] : memref<8x3xf32, #tpu.memory_space<smem>>
    %52 = vector.broadcast %51 : f32 to vector<1x256xf32>
    %53 = arith.mulf %3, %52 : vector<1x256xf32>
    %54 = arith.addf %50, %53 : vector<1x256xf32>
    %c3_30 = arith.constant 3 : index
    %c2_31 = arith.constant 2 : index
    %55 = memref.load %arg2[%c3_30, %c2_31] : memref<8x3xf32, #tpu.memory_space<smem>>
    %56 = vector.broadcast %55 : f32 to vector<1x256xf32>
    %57 = arith.mulf %5, %56 : vector<1x256xf32>
    %58 = arith.addf %54, %57 : vector<1x256xf32>
    %c3_32 = arith.constant 3 : index
    %59 = memref.load %arg3[%c3_32] : memref<8xf32, #tpu.memory_space<smem>>
    %60 = vector.broadcast %59 : f32 to vector<1x256xf32>
    %61 = arith.addf %58, %60 : vector<1x256xf32>
    %c4 = arith.constant 4 : index
    %c0_33 = arith.constant 0 : index
    %62 = memref.load %arg2[%c4, %c0_33] : memref<8x3xf32, #tpu.memory_space<smem>>
    %63 = vector.broadcast %62 : f32 to vector<1x256xf32>
    %64 = arith.mulf %1, %63 : vector<1x256xf32>
    %c4_34 = arith.constant 4 : index
    %c1_35 = arith.constant 1 : index
    %65 = memref.load %arg2[%c4_34, %c1_35] : memref<8x3xf32, #tpu.memory_space<smem>>
    %66 = vector.broadcast %65 : f32 to vector<1x256xf32>
    %67 = arith.mulf %3, %66 : vector<1x256xf32>
    %68 = arith.addf %64, %67 : vector<1x256xf32>
    %c4_36 = arith.constant 4 : index
    %c2_37 = arith.constant 2 : index
    %69 = memref.load %arg2[%c4_36, %c2_37] : memref<8x3xf32, #tpu.memory_space<smem>>
    %70 = vector.broadcast %69 : f32 to vector<1x256xf32>
    %71 = arith.mulf %5, %70 : vector<1x256xf32>
    %72 = arith.addf %68, %71 : vector<1x256xf32>
    %c4_38 = arith.constant 4 : index
    %73 = memref.load %arg3[%c4_38] : memref<8xf32, #tpu.memory_space<smem>>
    %74 = vector.broadcast %73 : f32 to vector<1x256xf32>
    %75 = arith.addf %72, %74 : vector<1x256xf32>
    %c5 = arith.constant 5 : index
    %c0_39 = arith.constant 0 : index
    %76 = memref.load %arg2[%c5, %c0_39] : memref<8x3xf32, #tpu.memory_space<smem>>
    %77 = vector.broadcast %76 : f32 to vector<1x256xf32>
    %78 = arith.mulf %1, %77 : vector<1x256xf32>
    %c5_40 = arith.constant 5 : index
    %c1_41 = arith.constant 1 : index
    %79 = memref.load %arg2[%c5_40, %c1_41] : memref<8x3xf32, #tpu.memory_space<smem>>
    %80 = vector.broadcast %79 : f32 to vector<1x256xf32>
    %81 = arith.mulf %3, %80 : vector<1x256xf32>
    %82 = arith.addf %78, %81 : vector<1x256xf32>
    %c5_42 = arith.constant 5 : index
    %c2_43 = arith.constant 2 : index
    %83 = memref.load %arg2[%c5_42, %c2_43] : memref<8x3xf32, #tpu.memory_space<smem>>
    %84 = vector.broadcast %83 : f32 to vector<1x256xf32>
    %85 = arith.mulf %5, %84 : vector<1x256xf32>
    %86 = arith.addf %82, %85 : vector<1x256xf32>
    %c5_44 = arith.constant 5 : index
    %87 = memref.load %arg3[%c5_44] : memref<8xf32, #tpu.memory_space<smem>>
    %88 = vector.broadcast %87 : f32 to vector<1x256xf32>
    %89 = arith.addf %86, %88 : vector<1x256xf32>
    %c6 = arith.constant 6 : index
    %c0_45 = arith.constant 0 : index
    %90 = memref.load %arg2[%c6, %c0_45] : memref<8x3xf32, #tpu.memory_space<smem>>
    %91 = vector.broadcast %90 : f32 to vector<1x256xf32>
    %92 = arith.mulf %1, %91 : vector<1x256xf32>
    %c6_46 = arith.constant 6 : index
    %c1_47 = arith.constant 1 : index
    %93 = memref.load %arg2[%c6_46, %c1_47] : memref<8x3xf32, #tpu.memory_space<smem>>
    %94 = vector.broadcast %93 : f32 to vector<1x256xf32>
    %95 = arith.mulf %3, %94 : vector<1x256xf32>
    %96 = arith.addf %92, %95 : vector<1x256xf32>
    %c6_48 = arith.constant 6 : index
    %c2_49 = arith.constant 2 : index
    %97 = memref.load %arg2[%c6_48, %c2_49] : memref<8x3xf32, #tpu.memory_space<smem>>
    %98 = vector.broadcast %97 : f32 to vector<1x256xf32>
    %99 = arith.mulf %5, %98 : vector<1x256xf32>
    %100 = arith.addf %96, %99 : vector<1x256xf32>
    %c6_50 = arith.constant 6 : index
    %101 = memref.load %arg3[%c6_50] : memref<8xf32, #tpu.memory_space<smem>>
    %102 = vector.broadcast %101 : f32 to vector<1x256xf32>
    %103 = arith.addf %100, %102 : vector<1x256xf32>
    %c7 = arith.constant 7 : index
    %c0_51 = arith.constant 0 : index
    %104 = memref.load %arg2[%c7, %c0_51] : memref<8x3xf32, #tpu.memory_space<smem>>
    %105 = vector.broadcast %104 : f32 to vector<1x256xf32>
    %106 = arith.mulf %1, %105 : vector<1x256xf32>
    %c7_52 = arith.constant 7 : index
    %c1_53 = arith.constant 1 : index
    %107 = memref.load %arg2[%c7_52, %c1_53] : memref<8x3xf32, #tpu.memory_space<smem>>
    %108 = vector.broadcast %107 : f32 to vector<1x256xf32>
    %109 = arith.mulf %3, %108 : vector<1x256xf32>
    %110 = arith.addf %106, %109 : vector<1x256xf32>
    %c7_54 = arith.constant 7 : index
    %c2_55 = arith.constant 2 : index
    %111 = memref.load %arg2[%c7_54, %c2_55] : memref<8x3xf32, #tpu.memory_space<smem>>
    %112 = vector.broadcast %111 : f32 to vector<1x256xf32>
    %113 = arith.mulf %5, %112 : vector<1x256xf32>
    %114 = arith.addf %110, %113 : vector<1x256xf32>
    %c7_56 = arith.constant 7 : index
    %115 = memref.load %arg3[%c7_56] : memref<8xf32, #tpu.memory_space<smem>>
    %116 = vector.broadcast %115 : f32 to vector<1x256xf32>
    %117 = arith.addf %114, %116 : vector<1x256xf32>
    %118 = tpu.concatenate %19, %33, %47, %61, %75, %89, %103, %117 in 0 : vector<1x256xf32>, vector<1x256xf32>, vector<1x256xf32>, vector<1x256xf32>, vector<1x256xf32>, vector<1x256xf32>, vector<1x256xf32>, vector<1x256xf32> -> vector<8x256xf32>
    %c0_57 = arith.constant 0 : index
    %c0_58 = arith.constant 0 : index
    %c0_59 = arith.constant 0 : index
    %119 = vector.load %arg5[%c0_57, %c0_58, %c0_59] : memref<1x8x256xf32, #tpu.memory_space<vmem>>, vector<1x8x256xf32>
    %120 = vector.shape_cast %119 : vector<1x8x256xf32> to vector<8x256xf32>
    %121 = vector.shape_cast %118 : vector<8x256xf32> to vector<1x8x256xf32>
    tpu.vector_store %arg5[%c0_57, %c0_58, %c0_59], %121 {strides = array<i32>} : memref<1x8x256xf32, #tpu.memory_space<vmem>>, vector<1x8x256xf32>,
    return
  }
  func.func @transform_0(%arg0: i32, %arg1: i32) -> (i32, i32) {
    %c0_i32 = arith.constant 0 : i32
    %c0_i32_0 = arith.constant 0 : i32
    %c0_i32_1 = arith.constant 0 : i32
    return %c0_i32, %c0_i32_0 : i32, i32
  }
  func.func @transform_1(%arg0: i32, %arg1: i32) -> i32 {
    %c0_i32 = arith.constant 0 : i32
    %c0_i32_0 = arith.constant 0 : i32
    return %c0_i32 : i32
  }
  func.func @transform_2(%arg0: i32, %arg1: i32) -> (i32, i32, i32) {
    %c0_i32 = arith.constant 0 : i32
    %c0_i32_0 = arith.constant 0 : i32
    return %arg0, %c0_i32, %arg1 : i32, i32, i32
  }
  func.func @transform_3(%arg0: i32, %arg1: i32) -> (i32, i32, i32) {
    %c0_i32 = arith.constant 0 : i32
    %c0_i32_0 = arith.constant 0 : i32
    return %arg0, %c0_i32, %arg1 : i32, i32, i32
  }
}

</mosaic_0001>

<bundles_post_ra>
// kernel: tpu_custom_call.1
= control target key start
LH: loop header
LB: loop body
LE: loop exit
PB: predicated region body
PF: predicated region fallthrough
CT: control target
= control target key end

     0   :  { %8 = vsyncpa [#allocation4], 0  ;;  %s1100_s0 = inlined_call_operand.vmem [shape: f32[8,3], index: 0, kind: input, shape index: {}]   ;;  %s1101_s1 = inlined_call_operand.vmem [shape: f32[8], index: 1, kind: input, shape index: {}]   ;;  %s1102_s2 = inlined_call_operand.vmem [shape: f32[2,3,256], index: 2, kind: input, shape index: {}]   ;;  %s1103_s3 = inlined_call_operand.hbm [shape: f32[2,8,256], index: 3, kind: output, shape index: {}]  }
   0x1   :  { %9 = vsyncpa [#allocation6], 0 }
   0x2   :  { %10 = vsyncpa [#allocation3], 0 }
   0x3   :  { %12 = vsyncpa [#allocation3 + $0x1], 0  ;;  %s836_s12 = smov 0   ;;  %s838_s13 = smov 0  }
   0x4   :  { %s840_s14 = smov 0   ;;  %s842_s15 = smov 0  }
   0x5   :  { %s844_s16 = smov 0   ;;  %s846_s17 = smov 0  }
   0x6 LB: > { %s570_s18 = sadd.s32 4294967295, %s811_s17   ;;  %s571_s19 = sadd.s32 4294967294, %s811_s17   ;;  %s811_s17 = sphi %s846_s17, %s18_s17   ;;  %s807_s16 = sphi %s844_s16, %s1121_s16   ;;  %s803_s15 = sphi %s842_s15, %s1120_s15   ;;  %s799_s14 = sphi %s840_s14, %s1119_s14   ;;  %s795_s13 = sphi %s838_s13, %s1118_s13   ;;  %s791_s12 = sphi %s836_s12, %s1117_s12  }
   0x7   : > { %s30_s20 = sadd.s32 1, %s807_s16  ;;  %s109_s21 = sadd.s32 1, %s799_s14 }
   0x8   : > { %p32_p0 = scmp.ge.s32.totalorder %s30_s20, 2  ;;  %p119_p1 = scmp.ne.s32.totalorder %s799_s14, %s795_s13 }
   0x9   : > { %p120_p2 = scmp.eq.s32.totalorder %s570_s18, 1  ;;  %p125_p3 = scmp.ne.s32.totalorder %s795_s13, %s791_s12 }
   0xa   : > { %s1123_s20 = smov (%p32_p0, %s30_s20), 0  ;;  %p126_p5 = scmp.eq.s32.totalorder %s571_s19, 1 }
   0xb   : > { %p876_p4 = por %p120_p2, %p119_p1  ;;  %s104_s23 = ssub.s32 %s807_s16, %s1123_s20 }
   0xc   : > { %p572_p6 = scmp.ge.s32.totalorder %s811_s17, 1  ;;  %p107_p7 = scmp.eq.s32.totalorder %s104_s23, 0 }
   0xd   : > { %s1108_s22 = scalar_select %p876_p4, 1, 0 }
   0xe   : > { %p883_p8 = por %p126_p5, %p125_p3  ;;  %p133_p9 = scmp.lt.s32.totalorder %s811_s17, 3 }
   0xf   : > { %s889_s25 = scalar_select %p107_p7, %s799_s14, %s109_s21  }
  0x10   : > { %s1109_s24 = scalar_select %p883_p8, 1, 0 }
  0x11   : > { %p891_p10 = pnand %p572_p6, %p133_p9  ;;  %p895_p11 = scmp.eq.s32.totalorder %s570_s18, 0 }
  0x12   : > { %s146_s30 = sshll.u32 %s1100_s0, 4  ;;  %s157_s6 = sshll.u32 %s1101_s1, 4  ;;  %s147_s30 = int_to_ptr.vmem [resolvable:$true] %s146_s30  ;;  %s158_s6 = int_to_ptr.vmem [resolvable:$true] %s157_s6 }
  0x13   : > { %s1110_s26 = scalar_select %p891_p10, 1, 0 }
  0x14   : > { %s1111_s27 = scalar_select %p895_p11, 1, 0 }
  0x15   : > { %p631_p12 = pneg %p891_p10  ;;  %s697_s8 = scalar_lea.vmem %s147_s30, 128 }
  0x16   : > { %p698_p0 = scmp.ne.s32.totalorder %s147_s30, %s697_s8  ;;  %p705_p5 = scmp.lt.s32.totalorder %s147_s30, %s147_s30 }
  0x17   : > { %p909_p13 = pnand %p895_p11, %p631_p12  ;;  %p706_p6 = scmp.lt.s32.totalorder %s697_s8, %s697_s8 }
  0x19   : > { %p699_p1 = pneg %p909_p13  ;;  %p707_p7 = por %p706_p6, %p705_p5 }
  0x1b   : > { %p700_p2 = pnand %p699_p1, %p698_p0 }
  0x1d   : > { %p701_p3 = pneg %p700_p2 }
  0x1f   : > { %p708_p9 = pnand %p707_p7, %p701_p3 }
  0x21   : > { %711 = shalt.err (!%p708_p9)
}
  0x22   : > { %s813_s9 = smov [#allocation2]   ;;  %s712_s10 = scalar_lea.vmem %s158_s6, 16 }
  0x23   : > { %634 = dma.vmem_to_smem (!%p909_p13), %s147_s30, 128, %s813_s9, [#allocation4]  }
  0x24   : > { %p713_p12 = scmp.ne.s32.totalorder %s158_s6, %s712_s10  ;;  %p720_p11 = scmp.lt.s32.totalorder %s158_s6, %s158_s6 }
  0x25   : > { %p721_p10 = scmp.lt.s32.totalorder %s712_s10, %s712_s10 }
  0x26   : > { %p715_p8 = pnand %p713_p12, %p699_p1 }
  0x27   : > { %p722_p0 = por %p721_p10, %p720_p11 }
  0x28   : > { %p716_p4 = pneg %p715_p8 }
  0x2a   : > { %p723_p2 = pnand %p722_p0, %p716_p4 }
  0x2c   : > { %726 = shalt.err (!%p723_p2)
}
  0x2d   : > { %s814_s11 = smov [#allocation5]   ;;  %p1113_p3 = scmp.ne.s32.totalorder %s1110_s26, 0 }
  0x2e   : > { %637 = dma.vmem_to_smem (!%p909_p13), %s158_s6, 16, %s814_s11, [#allocation6]  }
  0x2f   : > { %183 = sbr.rel (%p1113_p3) target bundleno = 119 (0x77), region = 32  ;;  %p1114_p5 = scmp.ne.s32.totalorder (!%p1113_p3), %s1111_s27, 0 }
  0x34   : > { %778 = dma.done.wait (%p1114_p5), [#allocation4], 128  }
  0x35   : > { %780 = vsyncadd (%p1114_p5), [#allocation4], 4294967168 }
  0x36   : > { %782 = dma.done.wait (%p1114_p5), [#allocation6], 16  }
  0x37   : > { %784 = vsyncadd (%p1114_p5), [#allocation6], 4294967280 }
  0x38   : > { %193 = sfence }
  0x39   : > { %p217_p4 = scmp.lt.s32.totalorder %s803_s15, 1  ;;  %s232_s18 = sld [smem:[#allocation2]]  ;;  %v345_v7 = vlaneseq  ;;  %vm432_vm0 = vcmask 1040384   ;;  %vm435_vm1 = vcmask 1041408   ;;  %vm438_vm2 = vcmask 1042432  }
  0x3a   : > { %s584_s19 = sld [smem:[#allocation2 + $0x1]]  ;;  %vm441_vm3 = vcmask 1043456   ;;  %vm444_vm4 = vcmask 1044480   ;;  %vm447_vm5 = vcmask 1045504   ;;  %vm450_vm6 = vcmask 1046528   ;;  %p1115_p10 = scmp.ne.s32.totalorder %s1108_s22, 0 }
  0x3b   : > { %s218_s21 = scalar_select %p217_p4, %s803_s15, 1  ;;  %v346_v13 = vshrl.u32 %v345_v7, 7 }
  0x3c   : > { %s585_s23 = sld [smem:[#allocation2 + $0x2]] }
  0x3d   : > { %s619_s26 = sshll.u32 %s218_s21, 3  ;;  %s931_s28 = sld [smem:[#allocation5]]  ;;  %v953_v22 = vsub.s32 0, %v346_v13  ;;  %v963_v31 = vsub.s32 1, %v346_v13 }
  0x3e   : > { %s224_s4 = scalar_lea.vmem %s1102_s2, %s619_s26  ;;  %s586_s5 = sld [smem:[#allocation2 + $0x80]] }
  0x3f   : > { %v936_v0 = vld [vmem:[%s224_s4] ss:$4 sm:$0x3]  ;;  %v938_v1 = vld [vmem:[%s224_s4 + $0x1] ss:$4 sm:$0x3]  ;;  %v233_v2 = vstv %s232_s18 }
  0x40   : > { %v940_v3 = vld [vmem:[%s224_s4 + $0x2] ss:$4 sm:$0x3]  ;;  %v234_v4 = vmul.f32 %v233_v2, %v936_v0  ;;  %v236_v5 = vstv %s584_s19  ;;  %s587_s27 = sld [smem:[#allocation2 + $0x81]] }
  0x41   : > { %v237_v6 = vmul.f32 %v938_v1, %v236_v5  ;;  %s588_s6 = sld [smem:[#allocation2 + $0x82]] }
  0x42   : > { %v240_v8 = vstv %s585_s23  ;;  %s944_s7 = sld [smem:[#allocation5 + $0x1]] }
  0x43   : > { %v238_v9 = vadd.f32 %v237_v6, %v234_v4  ;;  %v241_v10 = vmul.f32 %v940_v3, %v240_v8  ;;  %s590_s8 = sld [smem:[#allocation2 + $0x100]]  ;;  %v244_v16 = vstv %s931_s28 }
  0x44   : > { %v247_v11 = vstv %s586_s5  ;;  %s591_s9 = sld [smem:[#allocation2 + $0x101]] }
  0x45   : > { %v248_v12 = vmul.f32 %v247_v11, %v936_v0  ;;  %s592_s10 = sld [smem:[#allocation2 + $0x102]]  ;;  %v242_v14 = vadd.f32 %v241_v10, %v238_v9 }
  0x46   : > { %v250_v15 = vstv %s587_s27  ;;  %s948_s11 = sld [smem:[#allocation5 + $0x2]] }
  0x47   : > { %v251_v17 = vmul.f32 %v938_v1, %v250_v15  ;;  %v254_v18 = vstv %s588_s6  ;;  %s594_s18 = sld [smem:[#allocation2 + $0x180]]  ;;  %v245_v23 = vadd.f32 %v244_v16, %v242_v14 }
  0x48   : > { %v255_v19 = vmul.f32 %v940_v3, %v254_v18  ;;  %s595_s19 = sld [smem:[#allocation2 + $0x181]]  ;;  %v258_v24 = vstv %s944_s7 }
  0x49   : > { %v252_v20 = vadd.f32 %v251_v17, %v248_v12  ;;  %v261_v21 = vstv %s590_s8  ;;  %s596_s21 = sld [smem:[#allocation2 + $0x182]]  ;;  %v348_v38 = vrot.slane %v245_v23, %v953_v22  ;;  %v352_v44 = vrot.slane %v245_v23, %v963_v31 }
  0x4a   : > { %v262_v25 = vmul.f32 %v261_v21, %v936_v0  ;;  %v264_v26 = vstv %s591_s9  ;;  %s957_s23 = sld [smem:[#allocation5 + $0x3]] }
  0x4b   : > { %v256_v27 = vadd.f32 %v255_v19, %v252_v20  ;;  %v265_v28 = vmul.f32 %v938_v1, %v264_v26  ;;  %v268_v29 = vstv %s592_s10  ;;  %s598_s26 = sld [smem:[#allocation2 + $0x200]] }
  0x4c   : > { %v269_v30 = vmul.f32 %v940_v3, %v268_v29  ;;  %s961_s28 = sld [smem:[#allocation2 + $0x201]]  ;;  %v272_v35 = vstv %s948_s11 }
  0x4d   : > { %v259_v32 = vadd.f32 %v258_v24, %v256_v27  ;;  %v266_v33 = vadd.f32 %v265_v28, %v262_v25  ;;  %v275_v34 = vstv %s594_s18  ;;  %s965_s29 = sld [smem:[#allocation2 + $0x202]] }
  0x4e   : > { %v276_v36 = vmul.f32 %v275_v34, %v936_v0  ;;  %v278_v37 = vstv %s595_s19  ;;  %s969_s30 = sld [smem:[#allocation5 + $0x4]] }
  0x4f   : > { %v270_v39 = vadd.f32 %v269_v30, %v266_v33  ;;  %v279_v40 = vmul.f32 %v938_v1, %v278_v37  ;;  %v282_v41 = vstv %s596_s21  ;;  %s973_s4 = sld [smem:[#allocation2 + $0x280]]  ;;  %v359_v42 = vrot.slane %v259_v32, %v953_v22 }
  0x50   : > { %v283_v43 = vmul.f32 %v940_v3, %v282_v41  ;;  %s977_s5 = sld [smem:[#allocation2 + $0x281]]  ;;  %v363_v48 = vrot.slane %v259_v32, %v963_v31  ;;  %v286_v49 = vstv %s957_s23  ;;  %s213_s23 = sand.u32 1, %s795_s13  }
  0x51   : > { %v273_v45 = vadd.f32 %v272_v35, %v270_v39  ;;  %v280_v46 = vadd.f32 %v279_v40, %v276_v36  ;;  %v289_v47 = vstv %s598_s26  ;;  %s980_s27 = sld [smem:[#allocation2 + $0x282]]  ;;  %v433_v52 = vsel %vm432_vm0, %v348_v38, %v359_v42  ;;  %s579_s26 = sshll.u32 %s213_s23, 4 }
  0x52   : > { %v290_v50 = vmul.f32 %v289_v47, %v936_v0  ;;  %v292_v51 = vstv %s961_s28  ;;  %s986_s6 = sld [smem:[#allocation5 + $0x5]]  ;;  %v434_v62 = vsel %vm432_vm0, %v352_v44, %v363_v48  ;;  %s215_s28 = scalar_lea.vmem [#allocation7], %s579_s26 }
  0x53   : > { %v284_v53 = vadd.f32 %v283_v43, %v280_v46  ;;  %v293_v54 = vmul.f32 %v938_v1, %v292_v51  ;;  %v296_v55 = vstv %s965_s29  ;;  %s991_s7 = sld [smem:[#allocation2 + $0x300]]  ;;  %v370_v56 = vrot.slane %v273_v45, %v953_v22  ;;  %s472_s29 = sshll.u32 %s215_s28, 4  ;;  %s1049_s29 = int_to_ptr.vmem [resolvable:$true] %s472_s29 }
  0x54   : > { %v297_v57 = vmul.f32 %v940_v3, %v296_v55  ;;  %s995_s8 = sld [smem:[#allocation2 + $0x301]]  ;;  %v374_v58 = vrot.slane %v273_v45, %v963_v31  ;;  %v300_v63 = vstv %s969_s30  ;;  %s620_s30 = sshll.u32 %s803_s15, 8 }
  0x55   : > { %v287_v59 = vadd.f32 %v286_v49, %v284_v53  ;;  %v294_v60 = vadd.f32 %v293_v54, %v290_v50  ;;  %v303_v61 = vstv %s973_s4  ;;  %s999_s9 = sld [smem:[#allocation2 + $0x302]]  ;;  %v436_v5 = vsel %vm435_vm1, %v433_v52, %v370_v56  ;;  %s456_s15 = scalar_lea.sflag [#allocation3], %s213_s23 }
  0x56   : > { %v304_v2 = vmul.f32 %v303_v61, %v936_v0  ;;  %v306_v4 = vstv %s977_s5  ;;  %s1005_s10 = sld [smem:[#allocation5 + $0x6]]  ;;  %v437_v11 = vsel %vm435_vm1, %v434_v62, %v374_v58 }
  0x57   : > { %v298_v6 = vadd.f32 %v297_v57, %v294_v60  ;;  %v307_v7 = vmul.f32 %v938_v1, %v306_v4  ;;  %v310_v8 = vstv %s980_s27  ;;  %s610_s11 = sld [smem:[#allocation2 + $0x380]]  ;;  %v381_v9 = vrot.slane %v287_v59, %v953_v22  ;;  %s1054_s27 = scalar_lea.hbm %s1103_s3, %s620_s30 }
  0x58   : > { %v311_v10 = vmul.f32 %v940_v3, %v310_v8  ;;  %s1012_s18 = sld [smem:[#allocation2 + $0x381]]  ;;  %v385_v15 = vrot.slane %v287_v59, %v963_v31  ;;  %v314_v16 = vstv %s986_s6  ;;  %s727_s6 = scalar_lea.vmem %s1049_s29, 256 }
  0x59   : > { %v301_v12 = vadd.f32 %v300_v63, %v298_v6  ;;  %v308_v13 = vadd.f32 %v307_v7, %v304_v2  ;;  %v317_v14 = vstv %s991_s7  ;;  %s612_s19 = sld [smem:[#allocation2 + $0x382]]  ;;  %v439_v19 = vsel %vm438_vm2, %v436_v5, %v381_v9  ;;  %p728_p8 = scmp.ne.s32.totalorder %s1049_s29, %s727_s6 }
  0x5a   : > { %v318_v17 = vmul.f32 %v317_v14, %v936_v0  ;;  %v320_v18 = vstv %s995_s8  ;;  %s1020_s21 = sld [smem:[#allocation5 + $0x7]]  ;;  %v440_v30 = vsel %vm438_vm2, %v437_v11, %v385_v15  ;;  %s815_s7 = smov [#allocation7]  }
  0x5b   : > { %v312_v20 = vadd.f32 %v311_v10, %v308_v13  ;;  %v321_v21 = vmul.f32 %v938_v1, %v320_v18  ;;  %v324_v23 = vstv %s999_s9  ;;  %v392_v24 = vrot.slane %v301_v12, %v953_v22  ;;  %p729_p11 = pnand %p728_p8, %p1115_p10  ;;  %s731_s8 = sshll.u32 %s815_s7, 4  ;;  %s732_s8 = int_to_ptr.vmem [resolvable:$false] %s731_s8 }
  0x5c   : > { %v325_v25 = vmul.f32 %v940_v3, %v324_v23  ;;  %v396_v26 = vrot.slane %v301_v12, %v963_v31  ;;  %v328_v32 = vstv %s1005_s10  ;;  %s733_s9 = scalar_lea.vmem %s732_s8, 512  ;;  %p734_p1 = scmp.lt.s32.totalorder %s1049_s29, %s732_s8 }
  0x5d   : > { %v315_v27 = vadd.f32 %v314_v16, %v312_v20  ;;  %v322_v28 = vadd.f32 %v321_v21, %v318_v17  ;;  %v331_v29 = vstv %s610_s11  ;;  %v442_v35 = vsel %vm441_vm3, %v439_v19, %v392_v24  ;;  %p730_p13 = pneg %p729_p11  ;;  %p735_p6 = scmp.lt.s32.totalorder %s733_s9, %s727_s6 }
  0x5e   : > { %v332_v33 = vmul.f32 %v331_v29, %v936_v0  ;;  %v334_v34 = vstv %s1012_s18  ;;  %v443_v42 = vsel %vm441_vm3, %v440_v30, %v396_v26 }
  0x5f   : > { %v326_v36 = vadd.f32 %v325_v25, %v322_v28  ;;  %v335_v37 = vmul.f32 %v938_v1, %v334_v34  ;;  %v338_v38 = vstv %s612_s19  ;;  %v403_v39 = vrot.slane %v315_v27, %v953_v22  ;;  %p736_p7 = por %p735_p6, %p734_p1 }
  0x60   : > { %v339_v40 = vmul.f32 %v940_v3, %v338_v38  ;;  %v407_v41 = vrot.slane %v315_v27, %v963_v31  ;;  %v342_v44 = vstv %s1020_s21 }
  0x61   : > { %v329_v43 = vadd.f32 %v328_v32, %v326_v36  ;;  %v336_v0 = vadd.f32 %v335_v37, %v332_v33  ;;  %v445_v45 = vsel %vm444_vm4, %v442_v35, %v403_v39  ;;  %p737_p9 = pnand %p736_p7, %p730_p13 }
  0x62   : > { %v446_v48 = vsel %vm444_vm4, %v443_v42, %v407_v41 }
  0x63   : > { %v340_v46 = vadd.f32 %v339_v40, %v336_v0  ;;  %v414_v47 = vrot.slane %v329_v43, %v953_v22  ;;  %v418_v1 = vrot.slane %v329_v43, %v963_v31 }
  0x65   : > { %v343_v49 = vadd.f32 %v342_v44, %v340_v46  ;;  %v448_v3 = vsel %vm447_vm5, %v445_v45, %v414_v47  ;;  %v449_v50 = vsel %vm447_vm5, %v446_v48, %v418_v1 }
  0x67   : > { %v425_v51 = vrot.slane %v343_v49, %v953_v22  ;;  %v429_v52 = vrot.slane %v343_v49, %v963_v31 }
  0x69   : > { %v451_v53 = vsel %vm450_vm6, %v448_v3, %v425_v51  ;;  %v452_v54 = vsel %vm450_vm6, %v449_v50, %v429_v52 }
  0x6a   : > { %453 = vst [vmem:[%s215_s28] sm:$0xff] %v451_v53  ;;  %454 = vst [vmem:[%s215_s28 + $0x8] sm:$0xff] %v452_v54 }
  0x6b   : > { %740 = shalt.err (!%p737_p9)
}
  0x6c   : > { %s741_s10 = scalar_lea.hbm %s1054_s27, 256  ;;  %s745_s19 = scalar_lea.hbm %s1103_s3, 512 }
  0x6d   : > { %p742_p12 = scmp.ne.s32.totalorder %s1054_s27, %s741_s10  ;;  %p746_p3 = scmp.lt.s32.totalorder %s1054_s27, %s1103_s3 }
  0x6e   : > { %p747_p5 = scmp.lt.s32.totalorder %s745_s19, %s741_s10 }
  0x6f   : > { %p743_p0 = pnand %p742_p12, %p1115_p10 }
  0x70   : > { %p748_p4 = por %p747_p5, %p746_p3 }
  0x71   : > { %p744_p2 = pneg %p743_p0 }
  0x73   : > { %p749_p8 = pnand %p748_p4, %p744_p2 }
  0x75   : > { %752 = shalt.err (!%p749_p8)
}
  0x76   : > { %629 = dma.vmem_to_hbm [thread:$0]  (%p1115_p10), %s1049_s29, 256, %s1054_s27, %s456_s15  }
  0x77 PF: > { %p646_p11 = scmp.ge.s32.totalorder %s811_s17, 2  ;;  %s484_s26 = sand.u32 1, %s791_s12  }
  0x78   : > { %p1116_p13 = scmp.ne.s32.totalorder %s1109_s24, 0  ;;  %s485_s28 = scalar_lea.sflag [#allocation3], %s484_s26 }
  0x7a   : > { %p639_p1 = pnand %p646_p11, %p1116_p13 }
  0x7c   : > { %p640_p6 = pneg %p639_p1 }
  0x7e   : > { %786 = dma.done.wait (%p640_p6), %s485_s28, 256  }
  0x7f   : > { %788 = vsyncadd (%p640_p6), %s485_s28, 4294967040  ;;  %s18_s17 = sadd.s32 1, %s811_s17   ;;  %s1117_s12 = smov %s795_s13 }
  0x80   : > { %p15_p7 = scmp.ge.s32.totalorder %s18_s17, 4   ;;  %s1118_s13 = smov %s799_s14 }
  0x81   : > { %s1119_s14 = smov %s889_s25  ;;  %s1120_s15 = smov %s807_s16 }
  0x82   : > { %s1121_s16 = smov %s1123_s20  ;;  %17 = sbr.rel (!%p15_p7) target bundleno = 6 (0x6), region = 78 }
  0x87   :  { %490 = vsyncpa [#allocation3], 1 }
  0x88   :  { %492 = vsyncpa [#allocation3 + $0x1], 1 }
  0x89   :  { %493 = vsyncpa [#allocation4], 1 }
  0x8a   :  { %495 = vsyncpa [#allocation4 + $0x1], 1 }
  0x8b   :  { %496 = vsyncpa [#allocation6], 1 }

</bundles_post_ra>
